<compile_context>
chip_gen: v5e
topology: v5e:2x2
jax: 0.10.0
libtpu: 0.0.40
codegen_flags: <defaults>
</compile_context>

<pallas_src>
import functools

import jax
import jax.numpy as jnp
from jax.experimental import pallas as pl
from jax.experimental.pallas import tpu as pltpu


def _round_up(x: int, m: int) -> int:
    return ((x + m - 1) // m) * m


def _cmd_kernel(x1_ref, x2_ref, out_ref, acc_ref, *, n_moments: int, m_rows: int):
    d_idx = pl.program_id(0)

    # Zero the cross-tile accumulator on the first grid step.
    @pl.when(d_idx == 0)
    def _():
        acc_ref[...] = jnp.zeros_like(acc_ref)

    x1 = x1_ref[...].astype(jnp.float32)   # (N1, TILE_D)
    x2 = x2_ref[...].astype(jnp.float32)   # (N2, TILE_D)

    # First moments over the batch axis for this feature tile.
    mx1 = jnp.mean(x1, axis=0, keepdims=True)   # (1, TILE_D)
    mx2 = jnp.mean(x2, axis=0, keepdims=True)   # (1, TILE_D)
    sx1 = x1 - mx1
    sx2 = x2 - mx2

    # Per-moment squared differences (lane-wise; no sqrt / no cross-lane reduce
    # here — those are deferred to the final grid step).
    d0 = mx1 - mx2
    partials = [d0 * d0]

    # Running products instead of sx**k (fewer VALU ops per moment).
    p1 = sx1
    p2 = sx2
    for _ in range(2, n_moments + 1):
        p1 = p1 * sx1
        p2 = p2 * sx2
        ss1 = jnp.mean(p1, axis=0, keepdims=True)
        ss2 = jnp.mean(p2, axis=0, keepdims=True)
        d = ss1 - ss2
        partials.append(d * d)

    # Pad to a sublane-aligned (m_rows, TILE_D) block; zero rows are harmless
    # (sqrt(0) == 0 in the finalization). Single read-modify-write per step.
    if m_rows > n_moments:
        zeros = jnp.zeros_like(partials[0])
        partials.extend([zeros] * (m_rows - n_moments))
    stacked = jnp.concatenate(partials, axis=0)       # (m_rows, TILE_D)
    acc_ref[...] += stacked

    # Finalize on the last tile: cross-lane reduce per moment, sqrt, sum.
    @pl.when(d_idx == pl.num_programs(0) - 1)
    def _():
        per_moment = jnp.sum(acc_ref[...], axis=1, keepdims=True)   # (m_rows, 1)
        out_ref[0, 0] = jnp.sum(jnp.sqrt(per_moment))


def cmd(x1: jax.Array, x2: jax.Array, n_moments: int, tile_d: int | None = None) -> jax.Array:
    """Pallas implementation of CMD.forward(x1, x2, n_moments). Returns a scalar."""
    assert x1.ndim == 2 and x2.ndim == 2
    assert x1.shape[1] == x2.shape[1]
    n_moments = int(n_moments)
    assert n_moments >= 1

    n1, d = x1.shape
    n2, _ = x2.shape

    LANE = 128
    if tile_d is None:
        # Size the feature tile from a VMEM budget for the double-buffered
        # x1/x2 input tiles: 2 buffers * (N1 + N2) * TILE_D * itemsize.
        itemsize = max(x1.dtype.itemsize, x2.dtype.itemsize)
        budget = 16 * 1024 * 1024
        denom = max(2 * (n1 + n2) * itemsize, 1)
        max_tile = max(LANE, (budget // denom) // LANE * LANE)
        tile_d = int(min(max_tile, 1024))
    assert tile_d % LANE == 0 and tile_d > 0

    d_pad = _round_up(d, LANE)
    tile_d = min(tile_d, d_pad)
    d_pad = _round_up(d_pad, tile_d)

    # Zero-pad the feature dim: padded columns have zero mean / zero centered
    # values in both inputs, so every moment difference there is exactly 0.
    if d_pad != d:
        x1 = jnp.pad(x1, ((0, 0), (0, d_pad - d)))
        x2 = jnp.pad(x2, ((0, 0), (0, d_pad - d)))

    num_tiles = d_pad // tile_d
    m_rows = _round_up(n_moments, 8)   # sublane-aligned accumulator rows

    kernel = functools.partial(_cmd_kernel, n_moments=n_moments, m_rows=m_rows)

    out = pl.pallas_call(
        kernel,
        out_shape=jax.ShapeDtypeStruct((1, 1), jnp.float32),
        grid=(num_tiles,),
        in_specs=[
            pl.BlockSpec((n1, tile_d), lambda t: (0, t)),
            pl.BlockSpec((n2, tile_d), lambda t: (0, t)),
        ],
        out_specs=pl.BlockSpec((1, 1), lambda t: (0, 0), memory_space=pltpu.SMEM),
        scratch_shapes=[pltpu.VMEM((m_rows, tile_d), jnp.float32)],
        compiler_params=pltpu.CompilerParams(
            dimension_semantics=("arbitrary",),       # reduction axis (carried acc)
            vmem_limit_bytes=48 * 1024 * 1024,
        ),
    )(x1, x2)
    return out[0, 0]


def cmd_ref(x1, x2, n_moments):
    """Pure-JAX reference mirroring the PyTorch module exactly."""
    mx1 = jnp.mean(x1, 0)
    mx2 = jnp.mean(x2, 0)
    sx1 = x1 - mx1
    sx2 = x2 - mx2

    def matchnorm(a, b):
        return jnp.sum((a - b) ** 2) ** 0.5

    scms = matchnorm(mx1, mx2)
    for i in range(n_moments - 1):
        k = i + 2
        scms = scms + matchnorm(jnp.mean(sx1 ** k, 0), jnp.mean(sx2 ** k, 0))
    return scms


if __name__ == "__main__":
    key = jax.random.PRNGKey(0)
    k1, k2, k3, k4 = jax.random.split(key, 4)

    n_moments = 5

    # Case 1: tiny shape (batch=8, hidden=32) — single 128-lane tile.
    x1 = jax.random.normal(k1, (8, 32), dtype=jnp.float32)
    x2 = 0.5 * jax.random.normal(k2, (8, 32), dtype=jnp.float32) + 0.1
    out = cmd(x1, x2, n_moments)
    jax.block_until_ready(out)
    ref = cmd_ref(x1, x2, n_moments)
    assert jnp.allclose(out, ref, rtol=1e-4, atol=1e-5), (out, ref)

    # Case 2: exercise multi-tile accumulation across the feature grid axis and
    # unequal batch sizes (batch 8 vs 16, hidden=256, forced 128-lane tiles).
    y1 = jax.random.normal(k3, (8, 256), dtype=jnp.float32)
    y2 = 0.7 * jax.random.normal(k4, (16, 256), dtype=jnp.float32) - 0.2
    out2 = cmd(y1, y2, n_moments, tile_d=128)
    jax.block_until_ready(out2)
    ref2 = cmd_ref(y1, y2, n_moments)
    assert jnp.allclose(out2, ref2, rtol=1e-4, atol=1e-5), (out2, ref2)

    print("KERNEL_OK")
</pallas_src>

<mosaic_0001>
module attributes {stable_mosaic.version = 11 : i64} {
  func.func @_cmd_kernel(%arg0: i32, %arg1: memref<8x128xf32, #tpu.memory_space<vmem>>, %arg2: memref<8x128xf32, #tpu.memory_space<vmem>>, %arg3: memref<1x1xf32, #tpu.memory_space<smem>>, %arg4: memref<8x128xf32, #tpu.memory_space<vmem>>) attributes {dimension_semantics = [#tpu.dimension_semantics<arbitrary>], iteration_bounds = array<i64: 1>, scalar_prefetch = 0 : i64, scratch_operands = 1 : i64, tpu.core_type = #tpu.core_type<tc>, window_params = [{transform_indices = @transform_0, window_bounds = array<i64: 8, 128>}, {transform_indices = @transform_1, window_bounds = array<i64: 8, 128>}, {transform_indices = @transform_2, window_bounds = array<i64: 1, 1>}]} {
    %c0_i32 = arith.constant 0 : i32
    %0 = arith.cmpi eq, %arg0, %c0_i32 : i32
    %1 = arith.extui %0 : i1 to i32
    %c0_i32_0 = arith.constant 0 : i32
    %2 = arith.cmpi ne, %1, %c0_i32_0 : i32
    scf.if %2 {
      %cst_30 = arith.constant 0.000000e+00 : f32
      %75 = vector.broadcast %cst_30 : f32 to vector<8x128xf32>
      %c0_31 = arith.constant 0 : index
      %c0_32 = arith.constant 0 : index
      %76 = vector.load %arg4[%c0_31, %c0_32] : memref<8x128xf32, #tpu.memory_space<vmem>>, vector<8x128xf32>
      tpu.vector_store %arg4[%c0_31, %c0_32], %75 {strides = array<i32>} : memref<8x128xf32, #tpu.memory_space<vmem>>, vector<8x128xf32>,
    } else {
    }
    %c0 = arith.constant 0 : index
    %c0_1 = arith.constant 0 : index
    %3 = vector.load %arg1[%c0, %c0_1] : memref<8x128xf32, #tpu.memory_space<vmem>>, vector<8x128xf32>
    %c0_2 = arith.constant 0 : index
    %c0_3 = arith.constant 0 : index
    %4 = vector.load %arg2[%c0_2, %c0_3] : memref<8x128xf32, #tpu.memory_space<vmem>>, vector<8x128xf32>
    %cst = arith.constant dense<0.000000e+00> : vector<128xf32>
    %5 = vector.multi_reduction <add>, %3, %cst [0] : vector<8x128xf32> to vector<128xf32>
    %6 = vector.shape_cast %5 : vector<128xf32> to vector<1x128xf32>
    %cst_4 = arith.constant 8.000000e+00 : f32
    %7 = vector.broadcast %cst_4 : f32 to vector<1x128xf32>
    %8 = arith.divf %6, %7 : vector<1x128xf32>
    %cst_5 = arith.constant dense<0.000000e+00> : vector<128xf32>
    %9 = vector.multi_reduction <add>, %4, %cst_5 [0] : vector<8x128xf32> to vector<128xf32>
    %10 = vector.shape_cast %9 : vector<128xf32> to vector<1x128xf32>
    %cst_6 = arith.constant 8.000000e+00 : f32
    %11 = vector.broadcast %cst_6 : f32 to vector<1x128xf32>
    %12 = arith.divf %10, %11 : vector<1x128xf32>
    %13 = vector.broadcast %8 : vector<1x128xf32> to vector<8x128xf32>
    %14 = arith.subf %3, %13 : vector<8x128xf32>
    %15 = vector.broadcast %12 : vector<1x128xf32> to vector<8x128xf32>
    %16 = arith.subf %4, %15 : vector<8x128xf32>
    %17 = arith.subf %8, %12 : vector<1x128xf32>
    %18 = arith.mulf %17, %17 : vector<1x128xf32>
    %19 = arith.mulf %14, %14 : vector<8x128xf32>
    %20 = arith.mulf %16, %16 : vector<8x128xf32>
    %cst_7 = arith.constant dense<0.000000e+00> : vector<128xf32>
    %21 = vector.multi_reduction <add>, %19, %cst_7 [0] : vector<8x128xf32> to vector<128xf32>
    %22 = vector.shape_cast %21 : vector<128xf32> to vector<1x128xf32>
    %cst_8 = arith.constant 8.000000e+00 : f32
    %23 = vector.broadcast %cst_8 : f32 to vector<1x128xf32>
    %24 = arith.divf %22, %23 : vector<1x128xf32>
    %cst_9 = arith.constant dense<0.000000e+00> : vector<128xf32>
    %25 = vector.multi_reduction <add>, %20, %cst_9 [0] : vector<8x128xf32> to vector<128xf32>
    %26 = vector.shape_cast %25 : vector<128xf32> to vector<1x128xf32>
    %cst_10 = arith.constant 8.000000e+00 : f32
    %27 = vector.broadcast %cst_10 : f32 to vector<1x128xf32>
    %28 = arith.divf %26, %27 : vector<1x128xf32>
    %29 = arith.subf %24, %28 : vector<1x128xf32>
    %30 = arith.mulf %29, %29 : vector<1x128xf32>
    %31 = arith.mulf %19, %14 : vector<8x128xf32>
    %32 = arith.mulf %20, %16 : vector<8x128xf32>
    %cst_11 = arith.constant dense<0.000000e+00> : vector<128xf32>
    %33 = vector.multi_reduction <add>, %31, %cst_11 [0] : vector<8x128xf32> to vector<128xf32>
    %34 = vector.shape_cast %33 : vector<128xf32> to vector<1x128xf32>
    %cst_12 = arith.constant 8.000000e+00 : f32
    %35 = vector.broadcast %cst_12 : f32 to vector<1x128xf32>
    %36 = arith.divf %34, %35 : vector<1x128xf32>
    %cst_13 = arith.constant dense<0.000000e+00> : vector<128xf32>
    %37 = vector.multi_reduction <add>, %32, %cst_13 [0] : vector<8x128xf32> to vector<128xf32>
    %38 = vector.shape_cast %37 : vector<128xf32> to vector<1x128xf32>
    %cst_14 = arith.constant 8.000000e+00 : f32
    %39 = vector.broadcast %cst_14 : f32 to vector<1x128xf32>
    %40 = arith.divf %38, %39 : vector<1x128xf32>
    %41 = arith.subf %36, %40 : vector<1x128xf32>
    %42 = arith.mulf %41, %41 : vector<1x128xf32>
    %43 = arith.mulf %31, %14 : vector<8x128xf32>
    %44 = arith.mulf %32, %16 : vector<8x128xf32>
    %cst_15 = arith.constant dense<0.000000e+00> : vector<128xf32>
    %45 = vector.multi_reduction <add>, %43, %cst_15 [0] : vector<8x128xf32> to vector<128xf32>
    %46 = vector.shape_cast %45 : vector<128xf32> to vector<1x128xf32>
    %cst_16 = arith.constant 8.000000e+00 : f32
    %47 = vector.broadcast %cst_16 : f32 to vector<1x128xf32>
    %48 = arith.divf %46, %47 : vector<1x128xf32>
    %cst_17 = arith.constant dense<0.000000e+00> : vector<128xf32>
    %49 = vector.multi_reduction <add>, %44, %cst_17 [0] : vector<8x128xf32> to vector<128xf32>
    %50 = vector.shape_cast %49 : vector<128xf32> to vector<1x128xf32>
    %cst_18 = arith.constant 8.000000e+00 : f32
    %51 = vector.broadcast %cst_18 : f32 to vector<1x128xf32>
    %52 = arith.divf %50, %51 : vector<1x128xf32>
    %53 = arith.subf %48, %52 : vector<1x128xf32>
    %54 = arith.mulf %53, %53 : vector<1x128xf32>
    %55 = arith.mulf %43, %14 : vector<8x128xf32>
    %56 = arith.mulf %44, %16 : vector<8x128xf32>
    %cst_19 = arith.constant dense<0.000000e+00> : vector<128xf32>
    %57 = vector.multi_reduction <add>, %55, %cst_19 [0] : vector<8x128xf32> to vector<128xf32>
    %58 = vector.shape_cast %57 : vector<128xf32> to vector<1x128xf32>
    %cst_20 = arith.constant 8.000000e+00 : f32
    %59 = vector.broadcast %cst_20 : f32 to vector<1x128xf32>
    %60 = arith.divf %58, %59 : vector<1x128xf32>
    %cst_21 = arith.constant dense<0.000000e+00> : vector<128xf32>
    %61 = vector.multi_reduction <add>, %56, %cst_21 [0] : vector<8x128xf32> to vector<128xf32>
    %62 = vector.shape_cast %61 : vector<128xf32> to vector<1x128xf32>
    %cst_22 = arith.constant 8.000000e+00 : f32
    %63 = vector.broadcast %cst_22 : f32 to vector<1x128xf32>
    %64 = arith.divf %62, %63 : vector<1x128xf32>
    %65 = arith.subf %60, %64 : vector<1x128xf32>
    %66 = arith.mulf %65, %65 : vector<1x128xf32>
    %cst_23 = arith.constant 0.000000e+00 : f32
    %67 = vector.broadcast %cst_23 : f32 to vector<1x128xf32>
    %68 = tpu.concatenate %18, %30, %42, %54, %66, %67, %67, %67 in 0 : vector<1x128xf32>, vector<1x128xf32>, vector<1x128xf32>, vector<1x128xf32>, vector<1x128xf32>, vector<1x128xf32>, vector<1x128xf32>, vector<1x128xf32> -> vector<8x128xf32>
    %c0_24 = arith.constant 0 : index
    %c0_25 = arith.constant 0 : index
    %69 = vector.load %arg4[%c0_24, %c0_25] : memref<8x128xf32, #tpu.memory_space<vmem>>, vector<8x128xf32>
    %70 = arith.addf %69, %68 : vector<8x128xf32>
    %c0_26 = arith.constant 0 : index
    %c0_27 = arith.constant 0 : index
    %71 = vector.load %arg4[%c0_26, %c0_27] : memref<8x128xf32, #tpu.memory_space<vmem>>, vector<8x128xf32>
    tpu.vector_store %arg4[%c0_26, %c0_27], %70 {strides = array<i32>} : memref<8x128xf32, #tpu.memory_space<vmem>>, vector<8x128xf32>,
    %c0_i32_28 = arith.constant 0 : i32
    %72 = arith.cmpi eq, %arg0, %c0_i32_28 : i32
    %73 = arith.extui %72 : i1 to i32
    %c0_i32_29 = arith.constant 0 : i32
    %74 = arith.cmpi ne, %73, %c0_i32_29 : i32
    scf.if %74 {
      %c0_30 = arith.constant 0 : index
      %c0_31 = arith.constant 0 : index
      %75 = vector.load %arg4[%c0_30, %c0_31] : memref<8x128xf32, #tpu.memory_space<vmem>>, vector<8x128xf32>
      %cst_32 = arith.constant dense<0.000000e+00> : vector<8xf32>
      %76 = vector.multi_reduction <add>, %75, %cst_32 [1] : vector<8x128xf32> to vector<8xf32>
      %77 = vector.shape_cast %76 : vector<8xf32> to vector<8x1xf32>
      %78 = math.sqrt %77 : vector<8x1xf32>
      %79 = vector.shape_cast %78 : vector<8x1xf32> to vector<1x8x1xf32>
      %cst_33 = arith.constant dense<0.000000e+00> : vector<1xf32>
      %80 = vector.multi_reduction <add>, %79, %cst_33 [1, 2] : vector<1x8x1xf32> to vector<1xf32>
      %81 = vector.shape_cast %80 : vector<1xf32> to vector<1x1x1xf32>
      %82 = vector.extract %81[0, 0, 0] : f32 from vector<1x1x1xf32>
      %c0_34 = arith.constant 0 : index
      %c0_35 = arith.constant 0 : index
      %83 = memref.load %arg3[%c0_34, %c0_35] : memref<1x1xf32, #tpu.memory_space<smem>>
      memref.store %82, %arg3[%c0_34, %c0_35] : memref<1x1xf32, #tpu.memory_space<smem>>
    } else {
    }
    return
  }
  func.func @transform_0(%arg0: i32) -> (i32, i32) {
    %c0_i32 = arith.constant 0 : i32
    %c0_i32_0 = arith.constant 0 : i32
    return %c0_i32, %arg0 : i32, i32
  }
  func.func @transform_1(%arg0: i32) -> (i32, i32) {
    %c0_i32 = arith.constant 0 : i32
    %c0_i32_0 = arith.constant 0 : i32
    return %c0_i32, %arg0 : i32, i32
  }
  func.func @transform_2(%arg0: i32) -> (i32, i32) {
    %c0_i32 = arith.constant 0 : i32
    %c0_i32_0 = arith.constant 0 : i32
    %c0_i32_1 = arith.constant 0 : i32
    return %c0_i32, %c0_i32_0 : i32, i32
  }
}

</mosaic_0001>

<bundles_post_ra>
// kernel: tpu_custom_call.1
= control target key start
LH: loop header
LB: loop body
LE: loop exit
PB: predicated region body
PF: predicated region fallthrough
CT: control target
= control target key end

     0   :  { %7 = vsyncpa [#allocation4], 0  ;;  %s326_s0 = inlined_call_operand.hbm [shape: f32[8,128], index: 0, kind: input, shape index: {}]   ;;  %s327_s1 = inlined_call_operand.hbm [shape: f32[8,128], index: 1, kind: input, shape index: {}]   ;;  %s328_s2 = inlined_call_operand.hbm [shape: f32[1,1], index: 2, kind: output, shape index: {}]  }
   0x1   :  { %8 = vsyncpa [#allocation7], 0 }
   0x2   :  { %9 = vsyncpa [#allocation5], 0  ;;  %s15_s11 = sshll.u32 %s326_s0, 4  ;;  %s285_s12 = smov [#allocation3]   ;;  %s16_s11 = int_to_ptr.hbm [resolvable:$true] %s15_s11 }
   0x3   :  { %s17_s13 = sshll.u32 %s285_s12, 4  ;;  %s26_s16 = sshll.u32 %s327_s1, 4  ;;  %s18_s13 = int_to_ptr.vmem [resolvable:$true] %s17_s13  ;;  %s27_s16 = int_to_ptr.hbm [resolvable:$true] %s26_s16 }
   0x4   :  { %20 = dma.hbm_to_vmem [thread:$0]  %s16_s11, 128, %s18_s13, [#allocation4]  }
   0x5   :  { %s286_s17 = smov [#allocation6]  }
   0x6   :  { %s28_s18 = sshll.u32 %s286_s17, 4  ;;  %s29_s18 = int_to_ptr.vmem [resolvable:$true] %s28_s18 }
   0x7   :  { %31 = dma.hbm_to_vmem [thread:$0]  %s27_s16, 128, %s29_s18, [#allocation7]  }
   0x8   :  { %279 = dma.done.wait [#allocation4], 128  }
   0x9   :  { %280 = vsyncadd [#allocation4], 4294967168 }
   0xa   :  { %281 = dma.done.wait [#allocation7], 128  }
   0xb   :  { %282 = vsyncadd [#allocation7], 4294967168  ;;  %v287_v0 = vmov 8.0   ;;  %v45_v2 = vld [vmem:[#allocation3] sm:$0xff]  ;;  %v46_v3 = vld [vmem:[#allocation6] sm:$0xff]  ;;  %vm144_vm1 = vcmask 1040384  }
   0xc   :  { %215 = vrcp.f32 %v287_v0  ;;  %v47_v4 = vrot.slane %v45_v2, 4  ;;  %v61_v6 = vrot.slane %v46_v3, 4  ;;  %vm146_vm2 = vcmask 1041408   ;;  %s197_s19 = sshll.u32 %s328_s2, 4  ;;  %s288_s21 = smov [#allocation8]   ;;  %s198_s19 = int_to_ptr.hbm [resolvable:$true] %s197_s19 }
   0xd   :  { %vm148_vm3 = vcmask 1042432   ;;  %vm150_vm4 = vcmask 1043456   ;;  %vm152_vm5 = vcmask 1044480   ;;  %vm154_vm6 = vcmask 1045504  }
   0xe   :  { %v48_v7 = vadd.f32 %v47_v4, %v45_v2  ;;  %v62_v9 = vadd.f32 %v61_v6, %v46_v3  ;;  %vm156_vm7 = vcmask 1046528   ;;  %vm179_vm9 = vcmask 7168  }
  0x10   :  { %v49_v10 = vrot.slane %v48_v7, 2  ;;  %v63_v12 = vrot.slane %v62_v9, 2 }
  0x12   :  { %v216_v1 = vpop.eup %215  ;;  %v50_v13 = vadd.f32 %v49_v10, %v48_v7  ;;  %v64_v15 = vadd.f32 %v63_v12, %v62_v9 }
  0x13   :  { %v54_v5 = vmul.f32 8.0, %v216_v1  ;;  %vm58_vm0 = vweird.f32 %v216_v1 }
  0x14   :  { %v51_v16 = vrot.slane %v50_v13, 1  ;;  %v65_v17 = vrot.slane %v64_v15, 1 }
  0x15   :  { %v55_v8 = vsub.f32 1.0, %v54_v5 }
  0x16   :  { %v52_v19 = vadd.f32 %v51_v16, %v50_v13  ;;  %v66_v20 = vadd.f32 %v65_v17, %v64_v15 }
  0x17   :  { %v56_v11 = vmul.f32 %v216_v1, %v55_v8 }
  0x19   :  { %v57_v14 = vadd.f32 %v216_v1, %v56_v11 }
  0x1b   :  { %v310_v18 = vsel %vm58_vm0, %v216_v1, %v57_v14 }
  0x1c   :  { %v60_v21 = vmul.f32 %v310_v18, %v52_v19  ;;  %v67_v22 = vmul.f32 %v66_v20, %v310_v18 }
  0x1e   :  { %v68_v23 = vsub.f32 %v45_v2, %v60_v21  ;;  %v69_v24 = vsub.f32 %v46_v3, %v67_v22  ;;  %v70_v35 = vsub.f32 %v60_v21, %v67_v22 }
  0x20   :  { %v72_v25 = vmul.f32 %v68_v23, %v68_v23  ;;  %v73_v26 = vmul.f32 %v69_v24, %v69_v24  ;;  %v71_v14 = vmul.f32 %v70_v35, %v70_v35 }
  0x22   :  { %v74_v27 = vrot.slane %v72_v25, 4  ;;  %v81_v28 = vrot.slane %v73_v26, 4  ;;  %v90_v29 = vmul.f32 %v72_v25, %v68_v23  ;;  %v91_v30 = vmul.f32 %v73_v26, %v69_v24 }
  0x24   :  { %v75_v31 = vadd.f32 %v74_v27, %v72_v25  ;;  %v82_v32 = vadd.f32 %v81_v28, %v73_v26  ;;  %v92_v33 = vrot.slane %v90_v29, 4  ;;  %v99_v34 = vrot.slane %v91_v30, 4 }
  0x25   :  { %v108_v36 = vmul.f32 %v90_v29, %v68_v23  ;;  %v109_v37 = vmul.f32 %v91_v30, %v69_v24 }
  0x26   :  { %v76_v38 = vrot.slane %v75_v31, 2  ;;  %v83_v39 = vrot.slane %v82_v32, 2  ;;  %v93_v40 = vadd.f32 %v92_v33, %v90_v29  ;;  %v100_v41 = vadd.f32 %v99_v34, %v91_v30 }
  0x27   :  { %v110_v42 = vrot.slane %v108_v36, 4  ;;  %v117_v43 = vrot.slane %v109_v37, 4  ;;  %v126_v44 = vmul.f32 %v108_v36, %v68_v23  ;;  %v127_v45 = vmul.f32 %v109_v37, %v69_v24 }
  0x28   :  { %v77_v46 = vadd.f32 %v76_v38, %v75_v31  ;;  %v84_v47 = vadd.f32 %v83_v39, %v82_v32  ;;  %v94_v48 = vrot.slane %v93_v40, 2  ;;  %v101_v49 = vrot.slane %v100_v41, 2 }
  0x29   :  { %v111_v50 = vadd.f32 %v110_v42, %v108_v36  ;;  %v118_v51 = vadd.f32 %v117_v43, %v109_v37  ;;  %v128_v52 = vrot.slane %v126_v44, 4  ;;  %v135_v53 = vrot.slane %v127_v45, 4 }
  0x2a   :  { %v78_v54 = vrot.slane %v77_v46, 1  ;;  %v85_v55 = vrot.slane %v84_v47, 1  ;;  %v95_v56 = vadd.f32 %v94_v48, %v93_v40  ;;  %v102_v57 = vadd.f32 %v101_v49, %v100_v41 }
  0x2b   :  { %v112_v58 = vrot.slane %v111_v50, 2  ;;  %v119_v59 = vrot.slane %v118_v51, 2  ;;  %v129_v60 = vadd.f32 %v128_v52, %v126_v44  ;;  %v136_v61 = vadd.f32 %v135_v53, %v127_v45 }
  0x2c   :  { %v79_v62 = vadd.f32 %v78_v54, %v77_v46  ;;  %v86_v63 = vadd.f32 %v85_v55, %v84_v47  ;;  %v96_v0 = vrot.slane %v95_v56, 1  ;;  %v103_v1 = vrot.slane %v102_v57, 1 }
  0x2d   :  { %v113_v2 = vadd.f32 %v112_v58, %v111_v50  ;;  %v120_v3 = vadd.f32 %v119_v59, %v118_v51  ;;  %v130_v4 = vrot.slane %v129_v60, 2  ;;  %v137_v5 = vrot.slane %v136_v61, 2 }
  0x2e   :  { %v80_v6 = vmul.f32 %v79_v62, %v310_v18  ;;  %v87_v7 = vmul.f32 %v86_v63, %v310_v18  ;;  %v97_v8 = vadd.f32 %v96_v0, %v95_v56  ;;  %v104_v9 = vadd.f32 %v103_v1, %v102_v57 }
  0x2f   :  { %v114_v10 = vrot.slane %v113_v2, 1  ;;  %v121_v11 = vrot.slane %v120_v3, 1  ;;  %v131_v12 = vadd.f32 %v130_v4, %v129_v60  ;;  %v138_v13 = vadd.f32 %v137_v5, %v136_v61 }
  0x30   :  { %v88_v15 = vsub.f32 %v80_v6, %v87_v7  ;;  %v98_v16 = vmul.f32 %v97_v8, %v310_v18  ;;  %v105_v17 = vmul.f32 %v104_v9, %v310_v18 }
  0x31   :  { %v115_v19 = vadd.f32 %v114_v10, %v113_v2  ;;  %v122_v20 = vadd.f32 %v121_v11, %v120_v3  ;;  %v132_v21 = vrot.slane %v131_v12, 1  ;;  %v139_v22 = vrot.slane %v138_v13, 1 }
  0x32   :  { %v89_v23 = vmul.f32 %v88_v15, %v88_v15  ;;  %v106_v24 = vsub.f32 %v98_v16, %v105_v17 }
  0x33   :  { %v116_v25 = vmul.f32 %v115_v19, %v310_v18  ;;  %v123_v26 = vmul.f32 %v122_v20, %v310_v18  ;;  %v133_v27 = vadd.f32 %v132_v21, %v131_v12  ;;  %v140_v28 = vadd.f32 %v139_v22, %v138_v13 }
  0x34   :  { %v107_v29 = vmul.f32 %v106_v24, %v106_v24  ;;  %v145_v30 = vsel %vm144_vm1, %v71_v14, %v89_v23 }
  0x35   :  { %v124_v31 = vsub.f32 %v116_v25, %v123_v26  ;;  %v134_v32 = vmul.f32 %v133_v27, %v310_v18  ;;  %v141_v33 = vmul.f32 %v140_v28, %v310_v18 }
  0x36   :  { %v147_v34 = vsel %vm146_vm2, %v145_v30, %v107_v29 }
  0x37   :  { %v125_v35 = vmul.f32 %v124_v31, %v124_v31  ;;  %v142_v36 = vsub.f32 %v134_v32, %v141_v33 }
  0x39   :  { %v143_v37 = vmul.f32 %v142_v36, %v142_v36  ;;  %v149_v38 = vsel %vm148_vm3, %v147_v34, %v125_v35 }
  0x3b   :  { %v151_v39 = vsel %vm150_vm4, %v149_v38, %v143_v37 }
  0x3c   :  { %v153_v40 = vsel %vm152_vm5, %v151_v39, 0.0 }
  0x3d   :  { %v155_v41 = vsel %vm154_vm6, %v153_v40, 0.0 }
  0x3e   :  { %v157_v42 = vsel %vm156_vm7, %v155_v41, 0.0 }
  0x3f   :  { %165 = vadd.xlane.f32.xlu0 %v157_v42 }
  0xb2   :  { %v166_v43 = vpop.xlane.xlu0 %165 }
  0xb3   :  { %217 = vrsqrt.f32 %v166_v43  ;;  %vm174_vm8 = vcmp.eq.f32.partialorder %v166_v43, inf  ;;  %v177_v50 = vand.u32 2147483648, %v166_v43  ;;  %vm176_vm10 = vcmp.eq.f32.partialorder %v166_v43, 0.0 }
  0xb9   :  { %v218_v44 = vpop.eup %217 }
  0xba   :  { %v168_v45 = vmul.f32 %v218_v44, %v166_v43 }
  0xbc   :  { %v169_v18 = vmul.f32 %v218_v44, %v168_v45 }
  0xbe   :  { %v170_v46 = vmul.f32 0.5, %v169_v18 }
  0xc0   :  { %v171_v47 = vsub.f32 1.5, %v170_v46 }
  0xc2   :  { %v172_v48 = vmul.f32 %v218_v44, %v171_v47 }
  0xc4   :  { %v173_v49 = vmul.f32 %v172_v48, %v166_v43 }
  0xc6   :  { %v175_v51 = vsel %vm174_vm8, %v166_v43, %v173_v49 }
  0xc7   :  { %v178_v52 = vsel %vm176_vm10, %v177_v50, %v175_v51 }
  0xc8   :  { %v180_v53 = vsel %vm179_vm9, %v178_v52, 0.0 }
  0xc9   :  { %181 = vadd.xlane.f32.xlu0 %v180_v53 }
 0x13c   :  { %v182_v54 = vpop.xlane.xlu0 %181 }
 0x13d   :  { %v183_v55 = vrot.slane %v182_v54, 4 }
 0x13f   :  { %v184_v56 = vadd.f32 %v183_v55, %v182_v54 }
 0x141   :  { %v185_v57 = vrot.slane %v184_v56, 2 }
 0x143   :  { %v186_v58 = vadd.f32 %v185_v57, %v184_v56 }
 0x145   :  { %v187_v59 = vrot.slane %v186_v58, 1 }
 0x147   :  { %v188_v60 = vadd.f32 %v187_v59, %v186_v58 }
 0x149   :  { %209 = vpush %v188_v60 }
 0x17a   :  { %s210_s20 = spop %209 }
 0x17b   :  { %191 = sst [smem:[#allocation8]] %s210_s20 }
 0x17c   :  { %200 = dma.smem_to_hbm %s288_s21, 16, %s198_s19, [#allocation5]  }
 0x17d   :  { %283 = dma.done.wait [#allocation5], 16  }
 0x17e   :  { %284 = vsyncadd [#allocation5], 4294967280 }
 0x17f   :  { %205 = sfence }
 0x180   :  { %206 = vsyncpa [#allocation4], 1 }
 0x181   :  { %207 = vsyncpa [#allocation7], 1 }
 0x182   :  { %208 = vsyncpa [#allocation5], 1 }

</bundles_post_ra>
